<compile_context>
chip_gen: v5e
topology: v5e:2x2
jax: 0.10.0
libtpu: 0.0.40
codegen_flags: <defaults>
</compile_context>

<pallas_src>
import jax
import jax.numpy as jnp
from jax.experimental import pallas as pl
from jax.experimental.pallas import tpu as pltpu


def _round_up(x: int, m: int) -> int:
    return ((x + m - 1) // m) * m


def _vmem_budget_bytes() -> int:
    """3/4 of physical VMEM: ~96 MiB on v5e/v6e (128 MiB), ~48 MiB on v7x (64 MiB)."""
    cap = None
    try:
        cap = getattr(pltpu.get_tpu_info(), "vmem_capacity_bytes", None)
    except Exception:
        cap = None
    if not cap:
        cap = 64 * 1024 * 1024  # conservative fallback (v7x per-TC physical)
    return (int(cap) * 3) // 4


# --------------------------------------------------------------------------- kernels
def _linear_kernel_1k(x_ref, w_ref, b_ref, o_ref):
    """Single K step: no scratch, no pl.when — one MXU dot + bias epilogue."""
    o_ref[...] = (
        jnp.dot(x_ref[...], w_ref[...], preferred_element_type=jnp.float32)
        + b_ref[...]
    ).astype(o_ref.dtype)


def _linear_kernel_mk_f32out(x_ref, w_ref, b_ref, o_ref):
    """Multi-K, f32 output: accumulate directly into the resident output tile."""
    k = pl.program_id(2)

    @pl.when(k == 0)
    def _():
        o_ref[...] = jnp.zeros_like(o_ref)

    o_ref[...] += jnp.dot(x_ref[...], w_ref[...],
                          preferred_element_type=jnp.float32)

    @pl.when(k == pl.num_programs(2) - 1)
    def _():
        o_ref[...] += b_ref[...]


def _linear_kernel_mk_acc(x_ref, w_ref, b_ref, o_ref, acc_ref):
    """Multi-K, non-f32 output: f32 VMEM accumulator + cast epilogue."""
    k = pl.program_id(2)

    @pl.when(k == 0)
    def _():
        acc_ref[...] = jnp.zeros_like(acc_ref)

    acc_ref[...] += jnp.dot(x_ref[...], w_ref[...],
                            preferred_element_type=jnp.float32)

    @pl.when(k == pl.num_programs(2) - 1)
    def _():
        o_ref[...] = (acc_ref[...] + b_ref[...]).astype(o_ref.dtype)


# ------------------------------------------------------------------------- planning
def make_plan(batch: int, in_dim: int, out_dim: int,
              in_itemsize: int = 4, out_itemsize: int = 4) -> dict:
    """Pick (tm, tn, tk) and the scoped-VMEM limit for this problem shape."""
    tm = min(_round_up(batch, 8), 512)
    tn = min(_round_up(out_dim, 128), 512)
    tk = min(_round_up(in_dim, 128), 2048)

    budget = _vmem_budget_bytes()

    def ws(tm_, tn_, tk_):
        # double-buffered x + w tiles, double-buffered output, bias, worst-case acc
        return (2 * tm_ * tk_ * in_itemsize
                + 2 * tk_ * tn_ * in_itemsize
                + 2 * tn_ * in_itemsize
                + 2 * tm_ * tn_ * out_itemsize
                + tm_ * tn_ * 4)

    # Shrink until the working set fits comfortably (~60% of budget, headroom for
    # compiler-internal scratch).  Prefer keeping tk large (fewer K steps, less
    # accumulator RMW traffic per FLOP — matters most on v5e's single vst slot).
    while ws(tm, tn, tk) > (budget * 6) // 10:
        if tn > 256:
            tn //= 2
        elif tk > 256:
            tk //= 2
        elif tm > 64:
            tm //= 2
        elif tn > 128:
            tn //= 2
        elif tk > 128:
            tk //= 2
        elif tm > 8:
            tm //= 2
        else:
            break

    # v7x megacore: guarantee >= 2 independent (i, j) tiles when the shape allows,
    # so both TensorCores get work under dimension_semantics=("parallel", ...).
    if pl.cdiv(batch, tm) * pl.cdiv(out_dim, tn) == 1:
        if tn >= 256:
            tn //= 2
        elif tm >= 16:
            tm //= 2

    return dict(tm=tm, tn=tn, tk=tk, vmem_limit_bytes=budget)


def prepare_params(weight, bias, plan, *, operand_dtype=None):
    """Transpose + pad the (out_dim, in_dim) weight ONCE, at parameter-init time.

    Returns w_prepared: (K, N) lane-aligned, b_prepared: (1, N) float32.
    """
    out_dim, in_dim = weight.shape
    tn, tk = plan["tn"], plan["tk"]
    N = _round_up(out_dim, tn)
    K = _round_up(in_dim, tk)

    w_t = weight.T  # (in_dim, out_dim): native (M,K)@(K,N) MXU contraction layout
    if (K, N) != (in_dim, out_dim):
        w_t = jnp.pad(w_t, ((0, K - in_dim), (0, N - out_dim)))
    if operand_dtype is not None:
        w_t = w_t.astype(operand_dtype)

    b_p = bias if N == out_dim else jnp.pad(bias, (0, N - out_dim))
    b_p = b_p.reshape(1, N).astype(jnp.float32)
    return w_t, b_p


# -------------------------------------------------------------------------- forward
def linear_forward(x, w_prepared, b_prepared, plan, *, out_dim, operand_dtype=None):
    """y = x @ W^T + b with W already transposed/padded by prepare_params."""
    B, in_dim = x.shape
    K, N = w_prepared.shape
    tm, tn, tk = plan["tm"], plan["tn"], plan["tk"]
    assert K % tk == 0 and N % tn == 0
    M = _round_up(B, tm)
    out_dtype = x.dtype

    # Pad activations only when needed (zero K-padding contributes 0 to the dot).
    x_p = x if (M == B and K == in_dim) else jnp.pad(
        x, ((0, M - B), (0, K - in_dim)))
    if operand_dtype is not None:
        x_p = x_p.astype(operand_dtype)

    grid_k = K // tk

    if grid_k == 1:
        # Fast path: no accumulator, no pl.when, 2-D grid.
        kernel = _linear_kernel_1k
        grid = (M // tm, N // tn)
        in_specs = [
            pl.BlockSpec((tm, tk), lambda i, j: (i, 0)),
            pl.BlockSpec((tk, tn), lambda i, j: (0, j)),
            pl.BlockSpec((1, tn), lambda i, j: (0, j)),
        ]
        out_specs = pl.BlockSpec((tm, tn), lambda i, j: (i, j))
        scratch = []
        dims = ("parallel", "parallel")
    else:
        if out_dtype == jnp.float32:
            kernel = _linear_kernel_mk_f32out   # accumulate in resident o_ref
            scratch = []
        else:
            kernel = _linear_kernel_mk_acc      # keep f32 scratch for low-prec out
            scratch = [pltpu.VMEM((tm, tn), jnp.float32)]
        grid = (M // tm, N // tn, grid_k)       # reduction axis (K) last
        in_specs = [
            pl.BlockSpec((tm, tk), lambda i, j, k: (i, k)),
            pl.BlockSpec((tk, tn), lambda i, j, k: (k, j)),
            pl.BlockSpec((1, tn), lambda i, j, k: (0, j)),
        ]
        out_specs = pl.BlockSpec((tm, tn), lambda i, j, k: (i, j))
        dims = ("parallel", "parallel", "arbitrary")

    out_p = pl.pallas_call(
        kernel,
        out_shape=jax.ShapeDtypeStruct((M, N), out_dtype),
        grid_spec=pltpu.PrefetchScalarGridSpec(
            num_scalar_prefetch=0,
            grid=grid,
            in_specs=in_specs,
            out_specs=out_specs,
            scratch_shapes=scratch,
        ),
        compiler_params=pltpu.CompilerParams(
            dimension_semantics=dims,
            vmem_limit_bytes=plan["vmem_limit_bytes"],
        ),
    )(x_p, w_prepared, b_prepared)

    if M == B and N == out_dim:
        return out_p
    return out_p[:B, :out_dim]


def linear_regression_forward(x, weight, bias, *, operand_dtype=None):
    """One-shot convenience wrapper (exactly nn.Linear semantics).

    In production, hoist make_plan/prepare_params to parameter-init time (or jit the
    whole forward so XLA const-folds the weight transpose/pad), and fall back to a
    plain jnp.dot below a size threshold where the Pallas call is pure overhead.
    """
    plan = make_plan(x.shape[0], weight.shape[1], weight.shape[0])
    w_p, b_p = prepare_params(weight, bias, plan, operand_dtype=operand_dtype)
    return linear_forward(x, w_p, b_p, plan, out_dim=weight.shape[0],
                          operand_dtype=operand_dtype)


if __name__ == "__main__":
    key = jax.random.PRNGKey(0)
    k_x, k_w, k_b, k_x2, k_w2 = jax.random.split(key, 5)

    # --- small shapes consistent with the module: input_dim=32, output_dim=16 ---
    batch, input_dim, output_dim = 8, 32, 16
    x = jax.random.normal(k_x, (batch, input_dim), dtype=jnp.float32)
    bound = 1.0 / (input_dim ** 0.5)
    weight = jax.random.uniform(k_w, (output_dim, input_dim), jnp.float32, -bound, bound)
    bias = jax.random.uniform(k_b, (output_dim,), jnp.float32, -bound, bound)

    # Plan + weight prep done ONCE (init time), forward reuses prepared params.
    plan = make_plan(batch, input_dim, output_dim)
    w_prep, b_prep = prepare_params(weight, bias, plan)
    y = linear_forward(x, w_prep, b_prep, plan, out_dim=output_dim)
    jax.block_until_ready(y)

    y_ref = x @ weight.T + bias
    assert y.shape == (batch, output_dim)
    assert jnp.allclose(y, y_ref, atol=1e-5, rtol=1e-5)

    # --- secondary check: exercise the multi-K (accumulate-into-output) path ------
    in_dim2, out_dim2 = 4096, 16   # K > tk cap -> grid K dim of 2
    x2 = jax.random.normal(k_x2, (batch, in_dim2), dtype=jnp.float32)
    bound2 = 1.0 / (in_dim2 ** 0.5)
    w2 = jax.random.uniform(k_w2, (out_dim2, in_dim2), jnp.float32, -bound2, bound2)
    b2 = bias
    y2 = linear_regression_forward(x2, w2, b2)
    jax.block_until_ready(y2)
    y2_ref = x2 @ w2.T + b2
    assert y2.shape == (batch, out_dim2)
    # loose tolerance: reference jnp dot may use a lower-precision MXU pass
    assert jnp.allclose(y2, y2_ref, atol=2e-2, rtol=2e-2)

    print("KERNEL_OK")
</pallas_src>

<mosaic_0001>
module attributes {stable_mosaic.version = 11 : i64} {
  func.func @_linear_kernel_1k(%arg0: i32, %arg1: i32, %arg2: memref<8x128xf32, #tpu.memory_space<vmem>>, %arg3: memref<128x128xf32, #tpu.memory_space<vmem>>, %arg4: memref<1x128xf32, #tpu.memory_space<vmem>>, %arg5: memref<8x128xf32, #tpu.memory_space<vmem>>) attributes {dimension_semantics = [#tpu.dimension_semantics<parallel>, #tpu.dimension_semantics<parallel>], iteration_bounds = array<i64: 1, 1>, scalar_prefetch = 0 : i64, scratch_operands = 0 : i64, tpu.core_type = #tpu.core_type<tc>, window_params = [{transform_indices = @transform_0, window_bounds = array<i64: 8, 128>}, {transform_indices = @transform_1, window_bounds = array<i64: 128, 128>}, {transform_indices = @transform_2, window_bounds = array<i64: 1, 128>}, {transform_indices = @transform_3, window_bounds = array<i64: 8, 128>}]} {
    %c0 = arith.constant 0 : index
    %c0_0 = arith.constant 0 : index
    %0 = vector.load %arg2[%c0, %c0_0] : memref<8x128xf32, #tpu.memory_space<vmem>>, vector<8x128xf32>
    %c0_1 = arith.constant 0 : index
    %c0_2 = arith.constant 0 : index
    %1 = vector.load %arg3[%c0_1, %c0_2] : memref<128x128xf32, #tpu.memory_space<vmem>>, vector<128x128xf32>
    %cst = arith.constant dense<0.000000e+00> : vector<8x128xf32>
    %2 = tpu.matmul %0, %1, %cst {dimension_numbers = #tpu.dot_dimension_numbers<[1], [0], [0], [1], [0, 0, 1, 1], [], []>} : vector<8x128xf32>, vector<128x128xf32>, vector<8x128xf32> -> vector<8x128xf32>
    %c0_3 = arith.constant 0 : index
    %c0_4 = arith.constant 0 : index
    %3 = vector.load %arg4[%c0_3, %c0_4] : memref<1x128xf32, #tpu.memory_space<vmem>>, vector<1x128xf32>
    %4 = vector.broadcast %3 : vector<1x128xf32> to vector<8x128xf32>
    %5 = arith.addf %2, %4 : vector<8x128xf32>
    %c0_5 = arith.constant 0 : index
    %c0_6 = arith.constant 0 : index
    %6 = vector.load %arg5[%c0_5, %c0_6] : memref<8x128xf32, #tpu.memory_space<vmem>>, vector<8x128xf32>
    tpu.vector_store %arg5[%c0_5, %c0_6], %5 {strides = array<i32>} : memref<8x128xf32, #tpu.memory_space<vmem>>, vector<8x128xf32>,
    return
  }
  func.func @transform_0(%arg0: i32, %arg1: i32) -> (i32, i32) {
    %c0_i32 = arith.constant 0 : i32
    %c0_i32_0 = arith.constant 0 : i32
    return %arg0, %c0_i32 : i32, i32
  }
  func.func @transform_1(%arg0: i32, %arg1: i32) -> (i32, i32) {
    %c0_i32 = arith.constant 0 : i32
    %c0_i32_0 = arith.constant 0 : i32
    return %c0_i32, %arg1 : i32, i32
  }
  func.func @transform_2(%arg0: i32, %arg1: i32) -> (i32, i32) {
    %c0_i32 = arith.constant 0 : i32
    %c0_i32_0 = arith.constant 0 : i32
    return %c0_i32, %arg1 : i32, i32
  }
  func.func @transform_3(%arg0: i32, %arg1: i32) -> (i32, i32) {
    %c0_i32 = arith.constant 0 : i32
    return %arg0, %arg1 : i32, i32
  }
}

</mosaic_0001>

<bundles_post_ra>
// kernel: tpu_custom_call.1
= control target key start
LH: loop header
LB: loop body
LE: loop exit
PB: predicated region body
PF: predicated region fallthrough
CT: control target
= control target key end

     0   :  { %8 = vsyncpa [#allocation3], 0  ;;  %s226_s0 = inlined_call_operand.hbm [shape: f32[8,128], index: 0, kind: input, shape index: {}]   ;;  %s227_s1 = inlined_call_operand.hbm [shape: f32[128,128], index: 1, kind: input, shape index: {}]   ;;  %s228_s2 = inlined_call_operand.vmem [shape: f32[1,128], index: 2, kind: input, shape index: {}]   ;;  %s229_s3 = inlined_call_operand.hbm [shape: f32[8,128], index: 3, kind: output, shape index: {}]  }
   0x1   :  { %9 = vsyncpa [#allocation6], 0 }
   0x2   :  { %10 = vsyncpa [#allocation4], 0  ;;  %s16_s14 = sshll.u32 %s226_s0, 4  ;;  %s189_s15 = smov [#allocation2]   ;;  %s17_s14 = int_to_ptr.hbm [resolvable:$true] %s16_s14 }
   0x3   :  { %s18_s16 = sshll.u32 %s189_s15, 4  ;;  %s26_s19 = sshll.u32 %s227_s1, 4  ;;  %s19_s16 = int_to_ptr.vmem [resolvable:$true] %s18_s16  ;;  %s27_s19 = int_to_ptr.hbm [resolvable:$true] %s26_s19 }
   0x4   :  { %21 = dma.hbm_to_vmem [thread:$0]  %s17_s14, 128, %s19_s16, [#allocation3]  }
   0x5   :  { %s190_s20 = smov [#allocation5]   ;;  %s191_s22 = smov 128  }
   0x6   :  { %s28_s21 = sshll.u32 %s190_s20, 4  ;;  %s192_s23 = smov 8   ;;  %s29_s21 = int_to_ptr.vmem [resolvable:$true] %s28_s21 }
   0x7   :  { %34 = dma.hbm_to_vmem [thread:$0]  %s27_s19, 2048, %s29_s21, [#allocation6], %s191_s22, %s191_s22, %s192_s23  }
   0x8   :  { %183 = dma.done.wait [#allocation3], 128  }
   0x9   :  { %184 = vsyncadd [#allocation3], 4294967168 }
   0xa   :  { %185 = dma.done.wait [#allocation6], 2048  }
   0xb   :  { %186 = vsyncadd [#allocation6], 4294965248  ;;  %v61_v0 = vld [vmem:[#allocation5 + $0x78] sm:$0xff]  ;;  %v60_v1 = vld [vmem:[#allocation5 + $0x70] sm:$0xff]  ;;  %s193_s24 = smov [#allocation7]   ;;  %s94_s28 = sshll.u32 %s229_s3, 4  ;;  %s95_s28 = int_to_ptr.hbm [resolvable:$true] %s94_s28 }
   0xc   :  { %66 = vmatpush.msra.mxu0 %v61_v0  ;;  %v59_v2 = vld [vmem:[#allocation5 + $0x68] sm:$0xff]  ;;  %v58_v3 = vld [vmem:[#allocation5 + $0x60] sm:$0xff]  ;;  %v57_v4 = vld [vmem:[#allocation5 + $0x58] sm:$0xff]  ;;  %s92_s25 = sshll.u32 %s193_s24, 4  ;;  %s93_s25 = int_to_ptr.vmem [resolvable:$true] %s92_s25 }
   0xd   :  { %v56_v5 = vld [vmem:[#allocation5 + $0x50] sm:$0xff]  ;;  %v55_v6 = vld [vmem:[#allocation5 + $0x48] sm:$0xff]  ;;  %v54_v7 = vld [vmem:[#allocation5 + $0x40] sm:$0xff] }
   0xe   :  { %67 = vmatpush.msra.mxu0 %v60_v1  ;;  %v53_v8 = vld [vmem:[#allocation5 + $0x38] sm:$0xff]  ;;  %v52_v9 = vld [vmem:[#allocation5 + $0x30] sm:$0xff]  ;;  %v51_v10 = vld [vmem:[#allocation5 + $0x28] sm:$0xff] }
   0xf   :  { %v50_v11 = vld [vmem:[#allocation5 + $0x20] sm:$0xff]  ;;  %v49_v12 = vld [vmem:[#allocation5 + $0x18] sm:$0xff]  ;;  %v48_v13 = vld [vmem:[#allocation5 + $0x10] sm:$0xff] }
  0x10   :  { %68 = vmatpush.msra.mxu0 %v59_v2  ;;  %v47_v14 = vld [vmem:[#allocation5 + $0x8] sm:$0xff]  ;;  %v46_v15 = vld [vmem:[#allocation5] sm:$0xff]  ;;  %v45_v16 = vld [vmem:[#allocation2] sm:$0xff] }
  0x11   :  { %v110_v17 = vld [vmem:[%s228_s2] ss:$0 sm:$0xff] }
  0x12   :  { %69 = vmatpush.msra.mxu0 %v58_v3 }
  0x14   :  { %70 = vmatpush.msra.mxu0 %v57_v4 }
  0x16   :  { %71 = vmatpush.msra.mxu0 %v56_v5 }
  0x18   :  { %72 = vmatpush.msra.mxu0 %v55_v6 }
  0x1a   :  { %73 = vmatpush.msra.mxu0 %v54_v7 }
  0x1c   :  { %74 = vmatpush.msra.mxu0 %v53_v8 }
  0x1e   :  { %75 = vmatpush.msra.mxu0 %v52_v9 }
  0x20   :  { %76 = vmatpush.msra.mxu0 %v51_v10 }
  0x22   :  { %77 = vmatpush.msra.mxu0 %v50_v11 }
  0x24   :  { %78 = vmatpush.msra.mxu0 %v49_v12 }
  0x26   :  { %79 = vmatpush.msra.mxu0 %v48_v13 }
  0x28   :  { %80 = vmatpush.msra.mxu0 %v47_v14 }
  0x2a   :  { %81 = vmatpush.msra.mxu0 %v46_v15 }
  0x2b   :  { %82 = vmatmul.f32.vlgmr.msra.gmra.mxu0 %v45_v16 }
  0xa8   :  { %v83_v18 = vpop.f32.mrf.mxu0 }
  0xa9   :  { %v84_v19 = vadd.f32 %v110_v17, %v83_v18 }
  0xab   :  { %86 = vst [vmem:[#allocation7] sm:$0xff] %v84_v19 }
  0xac   :  { %97 = dma.vmem_to_hbm [thread:$0]  %s93_s25, 128, %s95_s28, [#allocation4]  }
  0xad   :  { %187 = dma.done.wait [#allocation4], 128  }
  0xae   :  { %188 = vsyncadd [#allocation4], 4294967168 }
  0xaf   :  { %102 = vsyncpa [#allocation3], 1 }
  0xb0   :  { %103 = vsyncpa [#allocation6], 1 }
  0xb1   :  { %104 = vsyncpa [#allocation4], 1 }

</bundles_post_ra>
